<compile_context>
chip_gen: v7x
topology: tpu7x:2x2x1
jax: 0.10.0
libtpu: 0.0.40
codegen_flags: <defaults>
</compile_context>

<pallas_src>
import functools

import jax
import jax.numpy as jnp
from jax.experimental import pallas as pl
from jax.experimental.pallas import tpu as pltpu


def _involution_kernel(x_ref, w1_ref, b1_ref, alpha_ref, w2_ref, b2_ref,
                       colmask_ref, o_ref, xbuf, *, K, W, pad, mxu_dtype):
    """One batch element per grid step; pixel index lives on the lane axis."""
    _, C, HW = o_ref.shape
    K2 = K * K
    PAD = pad * (W + 1)       # flat pad so tap (dy, dx) becomes lane offset dy*W + dx

    x = x_ref[0]                                               # (C, HW)

    # Padded flat line buffer.  Only the two small pad strips are zeroed; the
    # interior is written exactly once per step (no full-scratch zero pass).
    if pad > 0:
        xbuf[:, 0:PAD] = jnp.zeros((C, PAD), xbuf.dtype)
        xbuf[:, PAD + HW:PAD + HW + PAD] = jnp.zeros((C, PAD), xbuf.dtype)
    xbuf[:, PAD:PAD + HW] = x.astype(xbuf.dtype)               # cast once, not per tap

    # ---- weight branch: two 1x1 convs (per-pixel matmuls) + PReLU --------------
    # bf16 operands on the MXU, f32 accumulation.
    mid = jnp.dot(w1_ref[...], x.astype(mxu_dtype),
                  preferred_element_type=jnp.float32)           # (Cmid, HW)
    mid = mid + b1_ref[...]
    mid = jnp.where(mid > 0, mid, mid * alpha_ref[...])         # PReLU (per-Cmid alpha)

    # One batched matmul produces the dynamic weights of ALL K^2 taps at once,
    # already replicated group->channel (folded host-side), rows ordered (k, c).
    wgt = jnp.dot(w2_ref[...], mid.astype(mxu_dtype),
                  preferred_element_type=jnp.float32)           # (K2*C, HW)
    wgt = wgt + b2_ref[...]

    # ---- involution aggregation, lane-dense over the flat pixel axis -----------
    # TODO(synk): for K >= 5 switch to lax.fori_loop over dy (inner dx unrolled)
    # to bound live ranges; K2 == 9 here so a static unroll is cheapest.
    acc = jnp.zeros((C, HW), jnp.float32)
    for k in range(K2):
        dy, dx = k // K, k % K
        wk = wgt[k * C:(k + 1) * C, :]                          # (C, HW) slab of tap k
        if dx != pad:
            # Left/right-pad columns of the flat slice wrap into neighbouring
            # rows; zero the dynamic weight there (cheaper than masking patches).
            wk = wk * colmask_ref[dx:dx + 1, :]
        patch = xbuf[:, dy * W + dx: dy * W + dx + HW]          # shifted view, one live
        acc = acc + wk * patch
    o_ref[0] = acc.astype(o_ref.dtype)


def involution_forward(x_nchw, params, *, kernel_size, stride, group_channels,
                       mxu_dtype=jnp.bfloat16):
    """stride == 1 Involution forward. x_nchw: (B, C, H, W) -> (B, C, H, W)."""
    if stride != 1:
        # TODO(synk): stride > 1 (AvgPool on the weight branch + strided unfold)
        # is not implemented in the Pallas kernel; only stride == 1 is supported.
        raise NotImplementedError("stride > 1 not implemented")
    if kernel_size % 2 != 1:
        raise ValueError("kernel_size must be odd")

    B, C, H, W = x_nchw.shape
    if C % group_channels:
        raise ValueError("channels must be divisible by group_channels")
    K, K2 = kernel_size, kernel_size * kernel_size
    p = (K - 1) // 2
    HW = H * W
    PAD = p * (W + 1)
    L = HW + 2 * PAD

    w1 = params["w1"]                     # (Cmid, C) == conv1.weight[:, :, 0, 0]
    Cmid = w1.shape[0]

    # Host-side (cheap, one-time) re-layouts:
    #  * conv2 rows replicated group->channel and reordered (tap, channel) so one
    #    batched matmul yields each tap's (C, HW) slab as a contiguous slice.
    #  * per-dx column-validity masks (the flat pixel layout wraps rows at W edges).
    idx = ((jnp.arange(C)[None, :] // group_channels) * K2
           + jnp.arange(K2)[:, None]).reshape(-1)               # (K2*C,), (k, c) order
    w2rep = params["w2"][idx].astype(mxu_dtype)                 # (K2*C, Cmid)
    b2rep = params["b2"].reshape(-1)[idx][:, None].astype(jnp.float32)   # (K2*C, 1)
    w1m = w1.astype(mxu_dtype)
    b1c = params["b1"].reshape(Cmid, 1).astype(jnp.float32)
    alpha = params["alpha"].reshape(-1).astype(jnp.float32)
    if alpha.size == 1:
        alpha = jnp.broadcast_to(alpha, (Cmid,))                # shared nn.PReLU() alpha
    elif alpha.size != Cmid:
        raise ValueError("PReLU alpha must be scalar or per-channel (Cmid)")
    alpha = alpha.reshape(Cmid, 1)

    wcol = jnp.arange(HW, dtype=jnp.int32) % W
    shifted = wcol[None, :] + jnp.arange(K, dtype=jnp.int32)[:, None] - p
    colmask = ((shifted >= 0) & (shifted < W)).astype(jnp.float32)       # (K, HW)

    # Flat NCHW view (free reshape): pixel index on lanes -> lane-dense compute/stores.
    x_flat = x_nchw.reshape(B, C, HW)

    itemsize = jnp.dtype(x_nchw.dtype).itemsize
    block_bytes = C * HW * itemsize
    est = (4 * block_bytes                    # in + out blocks, double-buffered
           + C * L * 4                        # padded flat line-buffer scratch (f32)
           + 2 * K2 * C * HW * 4              # dynamic-weight tile + headroom
           + 6 * C * HW * 4)                  # acc / patch / slab temporaries
    vmem_limit = int(min(64 * 2**20, max(32 * 2**20, 2 * est)))

    flops = B * HW * (2 * Cmid * C + 2 * K2 * C * Cmid + 3 * K2 * C)
    bytes_accessed = (2 * B * block_bytes
                      + int(w1m.size + w2rep.size) * jnp.dtype(mxu_dtype).itemsize
                      + int(b1c.size + b2rep.size + alpha.size + colmask.size) * 4)
    cost = pl.CostEstimate(flops=int(flops), transcendentals=0,
                           bytes_accessed=int(bytes_accessed))

    kernel = functools.partial(_involution_kernel, K=K, W=W, pad=p,
                               mxu_dtype=mxu_dtype)

    # TODO(synk): for large H*W*C (esp. v7x's 64 MiB VMEM) add a spatial row-tile
    # grid axis with a PAD-lane halo on the flat buffer, and block several batch
    # elements per grid step when the per-image tile is tiny.
    out_flat = pl.pallas_call(
        kernel,
        out_shape=jax.ShapeDtypeStruct((B, C, HW), x_nchw.dtype),
        grid=(B,),
        in_specs=[
            pl.BlockSpec((1, C, HW), lambda b: (b, 0, 0)),      # x (single HBM stream)
            # Blocks below are grid-invariant (constant index map): fetched once,
            # resident in VMEM for the whole grid.
            pl.BlockSpec((Cmid, C), lambda b: (0, 0)),          # conv1 weight
            pl.BlockSpec((Cmid, 1), lambda b: (0, 0)),          # conv1 bias
            pl.BlockSpec((Cmid, 1), lambda b: (0, 0)),          # PReLU alpha
            pl.BlockSpec((K2 * C, Cmid), lambda b: (0, 0)),     # conv2 weight (folded)
            pl.BlockSpec((K2 * C, 1), lambda b: (0, 0)),        # conv2 bias (folded)
            pl.BlockSpec((K, HW), lambda b: (0, 0)),            # per-dx column masks
        ],
        out_specs=pl.BlockSpec((1, C, HW), lambda b: (b, 0, 0)),
        scratch_shapes=[pltpu.VMEM((C, L), jnp.float32)],       # padded flat line buffer
        compiler_params=pltpu.CompilerParams(
            dimension_semantics=("parallel",),
            vmem_limit_bytes=vmem_limit),
        cost_estimate=cost,
    )(x_flat, w1m, b1c, alpha, w2rep, b2rep, colmask)
    return out_flat.reshape(B, C, H, W)


def reference_involution(x_nchw, w1, b1, alpha, w2, b2, K, group_channels):
    """Pure-JAX f32 reference mirroring the PyTorch forward (NCHW)."""
    B, C, H, W = x_nchw.shape
    K2 = K * K
    p = (K - 1) // 2
    G = C // group_channels
    mid = jnp.einsum("mc,bchw->bmhw", w1, x_nchw) + b1[None, :, None, None]
    a = jnp.broadcast_to(alpha.reshape(-1), (mid.shape[1],))
    mid = jnp.where(mid > 0, mid, a[None, :, None, None] * mid)
    wgt = jnp.einsum("rm,bmhw->brhw", w2, mid) + b2[None, :, None, None]
    wgt = wgt.reshape(B, G, K2, H, W)
    xpad = jnp.pad(x_nchw, ((0, 0), (0, 0), (p, p), (p, p)))
    out = jnp.zeros((B, C, H, W), jnp.float32)
    for k in range(K2):
        dy, dx = k // K, k % K
        wk = jnp.repeat(wgt[:, :, k], group_channels, axis=1)   # (B, C, H, W)
        out = out + wk * xpad[:, :, dy:dy + H, dx:dx + W]
    return out


if __name__ == "__main__":
    # Small shapes consistent with the module: channels=4 -> groups=2, Cmid=1, K=3.
    B, C, H, W = 2, 4, 16, 16
    kernel_size, stride = 3, 1
    group_channels = 2
    groups = C // group_channels
    reduction_ratio = 4
    Cmid = C // reduction_ratio
    K2 = kernel_size ** 2

    key = jax.random.PRNGKey(0)
    k1, k2, k3, k4, kx = jax.random.split(key, 5)

    # PyTorch conv weights are (out, in, 1, 1); stored here as (out, in).
    w1 = jax.random.normal(k1, (Cmid, C), jnp.float32) * 0.1
    b1 = jax.random.normal(k2, (Cmid,), jnp.float32) * 0.1
    w2 = jax.random.normal(k3, (groups * K2, Cmid), jnp.float32) * 0.1
    b2 = jax.random.normal(k4, (groups * K2,), jnp.float32) * 0.1
    alpha = jnp.full((1,), 0.25, jnp.float32)   # nn.PReLU() default init (shared)

    x = jax.random.normal(kx, (B, C, H, W), jnp.float32)

    params = dict(w1=w1, b1=b1, w2=w2, b2=b2, alpha=alpha)
    out = involution_forward(x, params, kernel_size=kernel_size, stride=stride,
                             group_channels=group_channels)
    jax.block_until_ready(out)

    ref = reference_involution(x, w1, b1, alpha, w2, b2, kernel_size, group_channels)
    assert out.shape == (B, C, H, W)
    # bf16 MXU operands (f32 accumulation) in the kernel vs the f32 reference.
    assert jnp.allclose(out, ref, atol=3e-2, rtol=3e-2), "mismatch vs reference"
    print("KERNEL_OK")
</pallas_src>

<mosaic_0001>
module attributes {stable_mosaic.version = 11 : i64} {
  func.func @_involution_kernel(%arg0: i32, %arg1: memref<1x4x256xf32, #tpu.memory_space<vmem>>, %arg2: memref<1x4xbf16, #tpu.memory_space<vmem>>, %arg3: memref<1x1xf32, #tpu.memory_space<vmem>>, %arg4: memref<1x1xf32, #tpu.memory_space<vmem>>, %arg5: memref<36x1xbf16, #tpu.memory_space<vmem>>, %arg6: memref<36x1xf32, #tpu.memory_space<vmem>>, %arg7: memref<3x256xf32, #tpu.memory_space<vmem>>, %arg8: memref<1x4x256xf32, #tpu.memory_space<vmem>>, %arg9: memref<4x290xf32, #tpu.memory_space<vmem>>) attributes {dimension_semantics = [#tpu.dimension_semantics<parallel>], iteration_bounds = array<i64: 2>, scalar_prefetch = 0 : i64, scratch_operands = 1 : i64, tpu.core_type = #tpu.core_type<tc>, window_params = [{transform_indices = @transform_0, window_bounds = array<i64: 1, 4, 256>}, {pipeline_mode = #tpu.pipeline_mode<synchronous>, transform_indices = @transform_1, window_bounds = array<i64: 1, 4>}, {pipeline_mode = #tpu.pipeline_mode<synchronous>, transform_indices = @transform_2, window_bounds = array<i64: 1, 1>}, {pipeline_mode = #tpu.pipeline_mode<synchronous>, transform_indices = @transform_3, window_bounds = array<i64: 1, 1>}, {pipeline_mode = #tpu.pipeline_mode<synchronous>, transform_indices = @transform_4, window_bounds = array<i64: 36, 1>}, {pipeline_mode = #tpu.pipeline_mode<synchronous>, transform_indices = @transform_5, window_bounds = array<i64: 36, 1>}, {pipeline_mode = #tpu.pipeline_mode<synchronous>, transform_indices = @transform_6, window_bounds = array<i64: 3, 256>}, {transform_indices = @transform_7, window_bounds = array<i64: 1, 4, 256>}]} {
    %c0 = arith.constant 0 : index
    %c0_0 = arith.constant 0 : index
    %c0_1 = arith.constant 0 : index
    %0 = vector.load %arg1[%c0, %c0_0, %c0_1] : memref<1x4x256xf32, #tpu.memory_space<vmem>>, vector<1x4x256xf32>
    %1 = vector.shape_cast %0 : vector<1x4x256xf32> to vector<4x256xf32>
    %cst = arith.constant 0.000000e+00 : f32
    %2 = vector.broadcast %cst : f32 to vector<4x17xf32>
    %c0_2 = arith.constant 0 : index
    %c0_3 = arith.constant 0 : index
    %3 = vector.load %arg9[%c0_2, %c0_3] : memref<4x290xf32, #tpu.memory_space<vmem>>, vector<4x17xf32>
    tpu.vector_store %arg9[%c0_2, %c0_3], %2 {strides = array<i32>} : memref<4x290xf32, #tpu.memory_space<vmem>>, vector<4x17xf32>,
    %cst_4 = arith.constant 0.000000e+00 : f32
    %4 = vector.broadcast %cst_4 : f32 to vector<4x17xf32>
    %c0_5 = arith.constant 0 : index
    %c273 = arith.constant 273 : index
    %5 = vector.load %arg9[%c0_5, %c273] : memref<4x290xf32, #tpu.memory_space<vmem>>, vector<4x17xf32>
    tpu.vector_store %arg9[%c0_5, %c273], %4 {strides = array<i32>} : memref<4x290xf32, #tpu.memory_space<vmem>>, vector<4x17xf32>,
    %c0_6 = arith.constant 0 : index
    %c17 = arith.constant 17 : index
    %6 = vector.load %arg9[%c0_6, %c17] : memref<4x290xf32, #tpu.memory_space<vmem>>, vector<4x256xf32>
    tpu.vector_store %arg9[%c0_6, %c17], %1 {strides = array<i32>} : memref<4x290xf32, #tpu.memory_space<vmem>>, vector<4x256xf32>,
    %c0_7 = arith.constant 0 : index
    %c0_8 = arith.constant 0 : index
    %7 = vector.load %arg2[%c0_7, %c0_8] : memref<1x4xbf16, #tpu.memory_space<vmem>>, vector<1x4xbf16>
    %8 = arith.truncf %1 : vector<4x256xf32> to vector<4x256xbf16>
    %cst_9 = arith.constant dense<0.000000e+00> : vector<1x256xf32>
    %9 = tpu.matmul %7, %8, %cst_9 {dimension_numbers = #tpu.dot_dimension_numbers<[1], [0], [0], [1], [0, 0, 1, 1], [], []>} : vector<1x4xbf16>, vector<4x256xbf16>, vector<1x256xf32> -> vector<1x256xf32>
    %c0_10 = arith.constant 0 : index
    %c0_11 = arith.constant 0 : index
    %10 = vector.load %arg3[%c0_10, %c0_11] : memref<1x1xf32, #tpu.memory_space<vmem>>, vector<1x1xf32>
    %11 = vector.broadcast %10 : vector<1x1xf32> to vector<1x256xf32>
    %12 = arith.addf %9, %11 : vector<1x256xf32>
    %cst_12 = arith.constant 0.000000e+00 : f32
    %13 = vector.broadcast %cst_12 : f32 to vector<1x256xf32>
    %14 = arith.cmpf ogt, %12, %13 : vector<1x256xf32>
    %c0_13 = arith.constant 0 : index
    %c0_14 = arith.constant 0 : index
    %15 = vector.load %arg4[%c0_13, %c0_14] : memref<1x1xf32, #tpu.memory_space<vmem>>, vector<1x1xf32>
    %16 = vector.broadcast %15 : vector<1x1xf32> to vector<1x256xf32>
    %17 = arith.mulf %12, %16 : vector<1x256xf32>
    %18 = arith.select %14, %12, %17 : vector<1x256xi1>, vector<1x256xf32>
    %c0_15 = arith.constant 0 : index
    %c0_16 = arith.constant 0 : index
    %19 = vector.load %arg5[%c0_15, %c0_16] : memref<36x1xbf16, #tpu.memory_space<vmem>>, vector<36x1xbf16>
    %20 = arith.truncf %18 : vector<1x256xf32> to vector<1x256xbf16>
    %cst_17 = arith.constant dense<0.000000e+00> : vector<36x256xf32>
    %21 = tpu.matmul %19, %20, %cst_17 {dimension_numbers = #tpu.dot_dimension_numbers<[1], [0], [0], [1], [0, 0, 1, 1], [], []>} : vector<36x1xbf16>, vector<1x256xbf16>, vector<36x256xf32> -> vector<36x256xf32>
    %c0_18 = arith.constant 0 : index
    %c0_19 = arith.constant 0 : index
    %22 = vector.load %arg6[%c0_18, %c0_19] : memref<36x1xf32, #tpu.memory_space<vmem>>, vector<36x1xf32>
    %23 = vector.broadcast %22 : vector<36x1xf32> to vector<36x256xf32>
    %24 = arith.addf %21, %23 : vector<36x256xf32>
    %cst_20 = arith.constant 0.000000e+00 : f32
    %25 = vector.broadcast %cst_20 : f32 to vector<4x256xf32>
    %26 = vector.extract_strided_slice %24 {offsets = [0, 0], sizes = [4, 256], strides = [1, 1]} : vector<36x256xf32> to vector<4x256xf32>
    %c0_21 = arith.constant 0 : index
    %c0_22 = arith.constant 0 : index
    %27 = vector.load %arg7[%c0_21, %c0_22] : memref<3x256xf32, #tpu.memory_space<vmem>>, vector<1x256xf32>
    %28 = vector.broadcast %27 : vector<1x256xf32> to vector<4x256xf32>
    %29 = arith.mulf %26, %28 : vector<4x256xf32>
    %c0_23 = arith.constant 0 : index
    %c0_24 = arith.constant 0 : index
    %30 = vector.load %arg9[%c0_23, %c0_24] : memref<4x290xf32, #tpu.memory_space<vmem>>, vector<4x256xf32>
    %31 = arith.mulf %29, %30 : vector<4x256xf32>
    %32 = arith.addf %25, %31 : vector<4x256xf32>
    %33 = vector.extract_strided_slice %24 {offsets = [4, 0], sizes = [4, 256], strides = [1, 1]} : vector<36x256xf32> to vector<4x256xf32>
    %c0_25 = arith.constant 0 : index
    %c1 = arith.constant 1 : index
    %34 = vector.load %arg9[%c0_25, %c1] : memref<4x290xf32, #tpu.memory_space<vmem>>, vector<4x256xf32>
    %35 = arith.mulf %33, %34 : vector<4x256xf32>
    %36 = arith.addf %32, %35 : vector<4x256xf32>
    %37 = vector.extract_strided_slice %24 {offsets = [8, 0], sizes = [4, 256], strides = [1, 1]} : vector<36x256xf32> to vector<4x256xf32>
    %c2 = arith.constant 2 : index
    %c0_26 = arith.constant 0 : index
    %38 = vector.load %arg7[%c2, %c0_26] : memref<3x256xf32, #tpu.memory_space<vmem>>, vector<1x256xf32>
    %39 = vector.broadcast %38 : vector<1x256xf32> to vector<4x256xf32>
    %40 = arith.mulf %37, %39 : vector<4x256xf32>
    %c0_27 = arith.constant 0 : index
    %c2_28 = arith.constant 2 : index
    %41 = vector.load %arg9[%c0_27, %c2_28] : memref<4x290xf32, #tpu.memory_space<vmem>>, vector<4x256xf32>
    %42 = arith.mulf %40, %41 : vector<4x256xf32>
    %43 = arith.addf %36, %42 : vector<4x256xf32>
    %44 = vector.extract_strided_slice %24 {offsets = [12, 0], sizes = [4, 256], strides = [1, 1]} : vector<36x256xf32> to vector<4x256xf32>
    %c0_29 = arith.constant 0 : index
    %c0_30 = arith.constant 0 : index
    %45 = vector.load %arg7[%c0_29, %c0_30] : memref<3x256xf32, #tpu.memory_space<vmem>>, vector<1x256xf32>
    %46 = vector.broadcast %45 : vector<1x256xf32> to vector<4x256xf32>
    %47 = arith.mulf %44, %46 : vector<4x256xf32>
    %c0_31 = arith.constant 0 : index
    %c16 = arith.constant 16 : index
    %48 = vector.load %arg9[%c0_31, %c16] : memref<4x290xf32, #tpu.memory_space<vmem>>, vector<4x256xf32>
    %49 = arith.mulf %47, %48 : vector<4x256xf32>
    %50 = arith.addf %43, %49 : vector<4x256xf32>
    %51 = vector.extract_strided_slice %24 {offsets = [16, 0], sizes = [4, 256], strides = [1, 1]} : vector<36x256xf32> to vector<4x256xf32>
    %c0_32 = arith.constant 0 : index
    %c17_33 = arith.constant 17 : index
    %52 = vector.load %arg9[%c0_32, %c17_33] : memref<4x290xf32, #tpu.memory_space<vmem>>, vector<4x256xf32>
    %53 = arith.mulf %51, %52 : vector<4x256xf32>
    %54 = arith.addf %50, %53 : vector<4x256xf32>
    %55 = vector.extract_strided_slice %24 {offsets = [20, 0], sizes = [4, 256], strides = [1, 1]} : vector<36x256xf32> to vector<4x256xf32>
    %c2_34 = arith.constant 2 : index
    %c0_35 = arith.constant 0 : index
    %56 = vector.load %arg7[%c2_34, %c0_35] : memref<3x256xf32, #tpu.memory_space<vmem>>, vector<1x256xf32>
    %57 = vector.broadcast %56 : vector<1x256xf32> to vector<4x256xf32>
    %58 = arith.mulf %55, %57 : vector<4x256xf32>
    %c0_36 = arith.constant 0 : index
    %c18 = arith.constant 18 : index
    %59 = vector.load %arg9[%c0_36, %c18] : memref<4x290xf32, #tpu.memory_space<vmem>>, vector<4x256xf32>
    %60 = arith.mulf %58, %59 : vector<4x256xf32>
    %61 = arith.addf %54, %60 : vector<4x256xf32>
    %62 = vector.extract_strided_slice %24 {offsets = [24, 0], sizes = [4, 256], strides = [1, 1]} : vector<36x256xf32> to vector<4x256xf32>
    %c0_37 = arith.constant 0 : index
    %c0_38 = arith.constant 0 : index
    %63 = vector.load %arg7[%c0_37, %c0_38] : memref<3x256xf32, #tpu.memory_space<vmem>>, vector<1x256xf32>
    %64 = vector.broadcast %63 : vector<1x256xf32> to vector<4x256xf32>
    %65 = arith.mulf %62, %64 : vector<4x256xf32>
    %c0_39 = arith.constant 0 : index
    %c32 = arith.constant 32 : index
    %66 = vector.load %arg9[%c0_39, %c32] : memref<4x290xf32, #tpu.memory_space<vmem>>, vector<4x256xf32>
    %67 = arith.mulf %65, %66 : vector<4x256xf32>
    %68 = arith.addf %61, %67 : vector<4x256xf32>
    %69 = vector.extract_strided_slice %24 {offsets = [28, 0], sizes = [4, 256], strides = [1, 1]} : vector<36x256xf32> to vector<4x256xf32>
    %c0_40 = arith.constant 0 : index
    %c33 = arith.constant 33 : index
    %70 = vector.load %arg9[%c0_40, %c33] : memref<4x290xf32, #tpu.memory_space<vmem>>, vector<4x256xf32>
    %71 = arith.mulf %69, %70 : vector<4x256xf32>
    %72 = arith.addf %68, %71 : vector<4x256xf32>
    %73 = vector.extract_strided_slice %24 {offsets = [32, 0], sizes = [4, 256], strides = [1, 1]} : vector<36x256xf32> to vector<4x256xf32>
    %c2_41 = arith.constant 2 : index
    %c0_42 = arith.constant 0 : index
    %74 = vector.load %arg7[%c2_41, %c0_42] : memref<3x256xf32, #tpu.memory_space<vmem>>, vector<1x256xf32>
    %75 = vector.broadcast %74 : vector<1x256xf32> to vector<4x256xf32>
    %76 = arith.mulf %73, %75 : vector<4x256xf32>
    %c0_43 = arith.constant 0 : index
    %c34 = arith.constant 34 : index
    %77 = vector.load %arg9[%c0_43, %c34] : memref<4x290xf32, #tpu.memory_space<vmem>>, vector<4x256xf32>
    %78 = arith.mulf %76, %77 : vector<4x256xf32>
    %79 = arith.addf %72, %78 : vector<4x256xf32>
    %c0_44 = arith.constant 0 : index
    %c0_45 = arith.constant 0 : index
    %c0_46 = arith.constant 0 : index
    %80 = vector.load %arg8[%c0_44, %c0_45, %c0_46] : memref<1x4x256xf32, #tpu.memory_space<vmem>>, vector<1x4x256xf32>
    %81 = vector.shape_cast %80 : vector<1x4x256xf32> to vector<4x256xf32>
    %82 = vector.shape_cast %79 : vector<4x256xf32> to vector<1x4x256xf32>
    tpu.vector_store %arg8[%c0_44, %c0_45, %c0_46], %82 {strides = array<i32>} : memref<1x4x256xf32, #tpu.memory_space<vmem>>, vector<1x4x256xf32>,
    return
  }
  func.func @transform_0(%arg0: i32) -> (i32, i32, i32) {
    %c0_i32 = arith.constant 0 : i32
    %c0_i32_0 = arith.constant 0 : i32
    %c0_i32_1 = arith.constant 0 : i32
    return %arg0, %c0_i32, %c0_i32_0 : i32, i32, i32
  }
  func.func @transform_1(%arg0: i32) -> (i32, i32) {
    %c0_i32 = arith.constant 0 : i32
    %c0_i32_0 = arith.constant 0 : i32
    %c0_i32_1 = arith.constant 0 : i32
    return %c0_i32, %c0_i32_0 : i32, i32
  }
  func.func @transform_2(%arg0: i32) -> (i32, i32) {
    %c0_i32 = arith.constant 0 : i32
    %c0_i32_0 = arith.constant 0 : i32
    %c0_i32_1 = arith.constant 0 : i32
    return %c0_i32, %c0_i32_0 : i32, i32
  }
  func.func @transform_3(%arg0: i32) -> (i32, i32) {
    %c0_i32 = arith.constant 0 : i32
    %c0_i32_0 = arith.constant 0 : i32
    %c0_i32_1 = arith.constant 0 : i32
    return %c0_i32, %c0_i32_0 : i32, i32
  }
  func.func @transform_4(%arg0: i32) -> (i32, i32) {
    %c0_i32 = arith.constant 0 : i32
    %c0_i32_0 = arith.constant 0 : i32
    %c0_i32_1 = arith.constant 0 : i32
    return %c0_i32, %c0_i32_0 : i32, i32
  }
  func.func @transform_5(%arg0: i32) -> (i32, i32) {
    %c0_i32 = arith.constant 0 : i32
    %c0_i32_0 = arith.constant 0 : i32
    %c0_i32_1 = arith.constant 0 : i32
    return %c0_i32, %c0_i32_0 : i32, i32
  }
  func.func @transform_6(%arg0: i32) -> (i32, i32) {
    %c0_i32 = arith.constant 0 : i32
    %c0_i32_0 = arith.constant 0 : i32
    %c0_i32_1 = arith.constant 0 : i32
    return %c0_i32, %c0_i32_0 : i32, i32
  }
  func.func @transform_7(%arg0: i32) -> (i32, i32, i32) {
    %c0_i32 = arith.constant 0 : i32
    %c0_i32_0 = arith.constant 0 : i32
    %c0_i32_1 = arith.constant 0 : i32
    return %arg0, %c0_i32, %c0_i32_0 : i32, i32, i32
  }
}

</mosaic_0001>

<bundles_post_ra>
// kernel: tpu_custom_call.1
= control target key start
LH: loop header
LB: loop body
LE: loop exit
PB: predicated region body
PF: predicated region fallthrough
CT: control target
= control target key end

     0   :  { %s1239_s0 = inlined_call_operand.vmem [shape: f32[2,4,256], index: 0, kind: input, shape index: {}]   ;;  %s1240_s1 = inlined_call_operand.vmem [shape: bf16[1,4], index: 1, kind: input, shape index: {}]   ;;  %s1241_s2 = inlined_call_operand.<no memory space> [shape: f32[1,1], index: 2, kind: input, shape index: {}]   ;;  %s1242_s4 = inlined_call_operand.vmem [shape: bf16[36,1], index: 4, kind: input, shape index: {}]   ;;  %s1243_s5 = inlined_call_operand.vmem [shape: f32[36,1], index: 5, kind: input, shape index: {}]   ;;  %s1244_s6 = inlined_call_operand.vmem [shape: f32[3,256], index: 6, kind: input, shape index: {}]   ;;  %s1245_s7 = inlined_call_operand.hbm [shape: f32[2,4,256], index: 7, kind: output, shape index: {}]   ;;  %s1246_s3 = inlined_call_operand.<no memory space> [shape: f32[1,1], index: 3, kind: input, shape index: {}]  }
   0x1   :  { %v12_v0 = vstv %s1241_s2  ;;  %v14_v1 = vstv %s1246_s3 }
   0x2   :  { %13 = vst [vmem:[#allocation3] sm:$0x1] %v12_v0  ;;  %15 = vst [vmem:[#allocation4] sm:$0x1] %v14_v1 }
   0x3   :  { %16 = vsyncpa [#allocation6], 0 }
   0x4   :  { %18 = vsyncpa [#allocation6 + $0x1], 0  ;;  %s991_s28 = smov 0   ;;  %s993_s29 = smov 0  }
   0x5   :  { %s995_s30 = smov 0   ;;  %s997_s8 = smov 0  }
   0x6 LB: > { %s1012_s2 = sadd.s32 4294967295, %s931_s8   ;;  %s785_s3 = sadd.s32 4294967294, %s931_s8   ;;  %s931_s8 = sphi %s997_s8, %s1252_s8   ;;  %s927_s30 = sphi %s995_s30, %s1251_s30   ;;  %s923_s29 = sphi %s993_s29, %s1250_s29   ;;  %s919_s28 = sphi %s991_s28, %s1249_s28  }
   0x7   : > { %s1016_s9 = sadd.s32 1, %s931_s8   ;;  %s183_s10 = sadd.s32 1, %s927_s30 }
   0x8   : > { %s180_s11 = ssub.s32 %s931_s8, %s1016_s9  ;;  %p193_p0 = scmp.ne.s32.totalorder %s927_s30, %s923_s29 }
   0x9   : > { %p181_p1 = scmp.eq.s32.totalorder %s180_s11, 0  ;;  %p194_p2 = scmp.eq.s32.totalorder %s1012_s2, 1 }
   0xa   : > { %p199_p3 = scmp.ne.s32.totalorder %s923_s29, %s919_s28  ;;  %p200_p4 = scmp.eq.s32.totalorder %s785_s3, 1 }
   0xb   : > { %s1027_s12 = scalar_select %p181_p1, %s927_s30, %s183_s10  }
   0xc   : > { %p1029_p5 = por %p194_p2, %p193_p0  ;;  %p1033_p6 = por %p200_p4, %p199_p3 }
   0xd   : > { %p788_p7 = scmp.ge.s32.totalorder %s931_s8, 1  ;;  %p244_p8 = scmp.lt.s32.totalorder %s931_s8, 3 }
   0xf   : > { %p245_p9 = pnand %p788_p7, %p244_p8 }
  0x10   : > { %p276_p10 = scmp.lt.s32.totalorder (!%p245_p9), %s1012_s2, 1  ;;  %v933_v2 = vmov (!%p245_p9), 0   ;;  %v305_v3 = vld [vmem:[#allocation3] sm:$0x1] (!%p245_p9)  ;;  %v369_v4 = vld [vmem:[#allocation4] sm:$0x1] (!%p245_p9)  ;;  %v311_v25 = vlaneseq (!%p245_p9) }
  0x11   : > { %248 = sbr.rel (%p245_p9) target bundleno = 517 (0x205), region = 48  ;;  %358 = vmatprep.mubr.bf16.mxu0 (!%p245_p9), %v933_v2  ;;  %860 = vset.pattern.permute.xlu0 (!%p245_p9), %v933_v2  ;;  %vm319_vm0 = vcmask (!%p245_p9), 1041408   ;;  %v391_v8 = vld [vmem:[%s1243_s5 + $0x8] sm:$0xff] (!%p245_p9)  ;;  %s934_s22 = smov (!%p245_p9), 17   ;;  %v394_v11 = vld [vmem:[%s1243_s5 + $0x20] sm:$0xf] (!%p245_p9) }
  0x12   : > { %308 = vperm.xlu0 (!%p245_p9), %860, %v305_v3   ;;  %494 = vmatprep.mubr.bf16.mxu1 (!%p245_p9), %v933_v2  ;;  %v300_v12 = vld [vmem:[%s1240_s1] sm:$0x1] (!%p245_p9)  ;;  %vm315_vm1 = vcmask (!%p245_p9), 31744   ;;  %v392_v14 = vld [vmem:[%s1243_s5 + $0x10] sm:$0xff] (!%p245_p9)  ;;  %v393_v15 = vld [vmem:[%s1243_s5 + $0x18] sm:$0xff] (!%p245_p9)  ;;  %vm283_vm2 = vcmask (!%p245_p9), 134144  }
  0x13   : > { %861 = vset.pattern.permute.xlu1 (!%p245_p9), %v933_v2  ;;  %v390_v13 = vld [vmem:[%s1243_s5] sm:$0xff] (!%p245_p9)  ;;  %vm285_vm3 = vcmask (!%p245_p9), 273544   ;;  %vm291_vm4 = vcmask (!%p245_p9), 138240   ;;  %v935_v17 = vmov (!%p245_p9), 0.0   ;;  %vm295_vm5 = vcmask (!%p245_p9), 1043592   ;;  %s936_s17 = smov (!%p245_p9), 126  }
  0x14   : > { %284 = vst.msk [vmem:[#allocation2] sm:$0xf] (!%p245_p9), %vm283_vm2, %v935_v17  ;;  %vm296_vm6 = vcmask (!%p245_p9), 1047556   ;;  %s937_s18 = smov (!%p245_p9), 111   ;;  %s939_s20 = smov (!%p245_p9), 112   ;;  %v1087_v26 = vshrl.u32 (!%p245_p9), %v311_v25, 7 }
  0x15   : > { %286 = vst.msk [vmem:[#allocation2 + $0x8] sm:$0xf] (!%p245_p9), %vm285_vm3, %v935_v17  ;;  %vm297_vm7 = vmor (!%p245_p9), %vm296_vm6, %vm295_vm5  ;;  %s940_s21 = smov (!%p245_p9), 127   ;;  %s942_s23 = smov (!%p245_p9), 95   ;;  %vm443_vm9 = vcmask (!%p245_p9), 1040384   ;;  %v863_v47 = vld [vmem:[%s1242_s4] sm:$0xff] (!%p245_p9)  }
  0x16   : > { %372 = vperm.xlu0 (!%p245_p9), %860, %v369_v4   ;;  %s943_s24 = smov (!%p245_p9), 94   ;;  %v1090_v27 = vsub.s32 (!%p245_p9), 0, %v1087_v26  ;;  %v445_v43 = vsel (!%p245_p9), %vm443_vm9, 65535, %v933_v2  ;;  %v864_v48 = vld [vmem:[%s1242_s4 + $0x8] sm:$0xff] (!%p245_p9)   ;;  %vm433_vm11 = vcmask (!%p245_p9), 7168   ;;  %vm545_vm12 = vcmask (!%p245_p9), 1039360  }
  0x17   : > { %v865_v49 = vld [vmem:[%s1242_s4 + $0x10] ss:$0 sps:$4 sm:$0x33] (!%p245_p9)   ;;  %vm636_vm13 = vcmask (!%p245_p9), 900096   ;;  %vm598_vm14 = vcmask (!%p245_p9), 916480   ;;  %vm619_vm15 = vcmask (!%p245_p9), 908288  }
  0x18   : > { %s277_s15 = scalar_select %p276_p10, %s1012_s2, 1  ;;  %vm697_vm3 = vcmask 769024  }
  0x1a   : > { %s806_s16 = sshll.u32 %s277_s15, 3  ;;  %402 = vperm.xlu0 %860, %v391_v8   ;;  %v521_v8 = vsub.s32 1, %v1087_v26 }
  0x1b   : > { %s280_s19 = scalar_lea.vmem %s1239_s0, %s806_s16 }
  0x1c   : > { %v282_v5 = vld [vmem:[%s280_s19] sm:$0xff]  ;;  %s938_s19 = smov 96  }
  0x1d   : > { %v301_v6 = vcombine.high %v282_v5, %v282_v5  ;;  %v303_v7 = vpack.c.bf16 %v282_v5, %v282_v5  ;;  %288 = vrot.lane.b32.xlu1 %v282_v5, %s934_s22  ;;  %s941_s22 = smov 110  }
  0x1e   : > { %417 = vperm.xlu0 %860, %v394_v11  }
  0x1f   : > { %v304_v9 = vpack.c.bf16 %v301_v6, %v301_v6  ;;  %v321_v10 = vsel %vm319_vm0, %v303_v7, 0  ;;  %v513_v7 = vld [vmem:[%s1244_s6] ss:$4 sm:$0x3] }
  0x20   : > { %v1128_v11 = vrot.slane %v513_v7, %v1090_v27 }
  0x21   : > { %792 = vmatprep.subr.msk.bf16.mxu0 %vm319_vm0, %v304_v9  ;;  %397 = vperm.xlu1 %861, %v390_v13   ;;  %vm581_vm0 = vcmask 1031168  }
  0x22   : > { %327 = vmatpush1.bf16.msra.mxu0 %v321_v10 }
  0x25   : > { %793 = vmatmul.mubr.msk.bf16.vlgmr.msra.gmra.mrb[0].mxu0 %vm315_vm1, %v300_v12  ;;  %407 = vperm.xlu1 %861, %v392_v14   ;;  %v800_v12 = vld [vmem:[%s1244_s6 + $0x2] ss:$4 sm:$0x3]  ;;  %vm659_vm1 = vcmask 785408  }
  0x26   : > { %484 = vmatprep.mubr.bf16.mxu0 %v933_v2 }
  0x29   : > { %412 = vperm.xlu1 %861, %v393_v15   ;;  %v1133_v15 = vrot.slane %v513_v7, %v521_v8 }
  0x8f   : > { %v289_v16 = vpop.permute.xlu1 %288 }
  0x90   : > { %v290_v18 = vrot.slane %v289_v16, 4 }
  0x91   : > { %v309_v28 = vpop.permute.xlu0 %308 }
  0x92   : > { %v292_v19 = vsel %vm291_vm4, %v290_v18, %v289_v16  ;;  %299 = vst.msk [vmem:[#allocation2 + $0x8] sm:$0xf] %vm283_vm2, %v290_v18  ;;  %v314_v29 = vrot.slane %v309_v28, %v1090_v27  ;;  %vm674_vm2 = vcmask 777216  }
  0x93   : > { %298 = vst.msk [vmem:[#allocation2] sm:$0xff] %vm297_vm7, %v292_v19 }
  0x95   : > { %v373_v30 = vpop.permute.xlu0 %372 }
  0x96   : > { %v378_v32 = vrot.slane %v373_v30, %v1090_v27 }
  0x99   : > { %v535_v20 = vld [vmem:[#allocation2 + $0x8] sm:$0xf]  ;;  %v1105_v52 = vpop.permute.xlu0 %402 }
  0x9a   : > { %579 = vrot.lane.b32.xlu0 %v535_v20, %s936_s17  ;;  %617 = vrot.lane.b32.xlu1 %v535_v20, %s937_s18  ;;  %v1067_v21 = vld [vmem:[#allocation2] sm:$0xff]  ;;  %v538_v22 = vcombine.low %v535_v20, %v535_v20 }
  0x9b   : > { %v537_v23 = vcombine.low %v1067_v21, %v1067_v21  ;;  %v1079_v24 = vcombine.high %v1067_v21, %v1067_v21 }
  0x9d   : > { %v1109_v54 = vpop.permute.xlu0 %417 }
  0x9e   : > { %575 = vrot.lane.b32.xlu0 %v1067_v21, %s936_s17  ;;  %657 = vrot.lane.b32.xlu1 %v535_v20, %s938_s19 }
  0xa0   : > { %v398_v50 = vpop.permute.xlu1 %397 }
  0xa2   : > { %594 = vrot.lane.b32.xlu0 %v1067_v21, %s939_s20  ;;  %541 = vrot.lane.b32.xlu1 %v1067_v21, %s940_s21 }
  0xa4   : > { %v408_v51 = vpop.permute.xlu1 %407 }
  0xa6   : > { %543 = vrot.lane.b32.xlu0 %v538_v22, %s940_s21  ;;  %613 = vrot.lane.b32.xlu1 %v1067_v21, %s937_s18 }
  0xa8   : > { %v1107_v53 = vpop.permute.xlu1 %412 }
  0xaa   : > { %634 = vrot.lane.b32.xlu0 %v538_v22, %s941_s22  ;;  %632 = vrot.lane.b32.xlu1 %v1067_v21, %s941_s22 }
  0xae   : > { %539 = vrot.lane.b32.xlu0 %v537_v23, %s940_s21  ;;  %653 = vrot.lane.b32.xlu1 %v1067_v21, %s938_s19  ;;  %s807_s21 = sshll.u32 %s1012_s2, 7  ;;  %s944_s2 = smov [#allocation5]  }
  0xaf   : > { %s1195_s26 = scalar_lea.hbm %s1245_s7, %s807_s21  ;;  %s873_s10 = sshll.u32 %s944_s2, 4  ;;  %s874_s10 = int_to_ptr.vmem [resolvable:$false] %s873_s10 }
  0xb0   : > { %s875_s11 = scalar_lea.vmem %s874_s10, 256 }
  0xb2   : > { %672 = vrot.lane.b32.xlu0 %v538_v22, %s942_s23  ;;  %596 = vrot.lane.b32.xlu1 %v538_v22, %s939_s20  ;;  %v1137_v22 = vrot.slane %v800_v12, %v1090_v27 }
  0xb6   : > { %615 = vrot.lane.b32.xlu0 %v1079_v24, %s937_s18  ;;  %577 = vrot.lane.b32.xlu1 %v1079_v24, %s936_s17 }
  0xba   : > { %630 = vrot.lane.b32.xlu0 %v537_v23, %s941_s22  ;;  %592 = vrot.lane.b32.xlu1 %v537_v23, %s939_s20 }
  0xbe   : > { %655 = vrot.lane.b32.xlu0 %v1079_v24, %s938_s19  ;;  %670 = vrot.lane.b32.xlu1 %v1067_v21, %s942_s23  ;;  %s273_s19 = sand.u32 1, %s923_s29  }
  0xbf   : > { %s789_s20 = sshll.u32 %s273_s19, 3  ;;  %s712_s27 = scalar_lea.sflag [#allocation6], %s273_s19 }
  0xc0   : > { %s275_s22 = scalar_lea.vmem [#allocation5], %s789_s20 }
  0xc2   : > { %668 = vrot.lane.b32.xlu0 %v537_v23, %s942_s23  ;;  %691 = vrot.lane.b32.xlu1 %v1067_v21, %s943_s24  ;;  %s726_s23 = sshll.u32 %s275_s22, 4  ;;  %s1197_s23 = int_to_ptr.vmem [resolvable:$true] %s726_s23 }
  0xc3   : > { %s869_s3 = scalar_lea.vmem %s1197_s23, 128  ;;  %p876_p0 = scmp.lt.s32.totalorder %s1197_s23, %s874_s10 }
  0xc4   : > { %p870_p11 = scmp.ne.s32.totalorder %s1197_s23, %s869_s3  ;;  %p877_p1 = scmp.lt.s32.totalorder %s875_s11, %s869_s3 }
  0xc6   : > { %693 = vrot.lane.b32.xlu0 %v1079_v24, %s943_s24  ;;  %695 = vrot.lane.b32.xlu1 %v535_v20, %s943_s24  ;;  %p871_p12 = pnand %p870_p11, %p1029_p5  ;;  %p878_p2 = por %p877_p1, %p876_p0 }
  0xc8   : > { %p872_p13 = pneg %p871_p12 }
  0xca   : > { %p879_p3 = pnand %p878_p2, %p872_p13 }
  0xf8   : > { %v360_v31 = vpop.f32.mrb[0].mxu0 }
  0xf9   : > { %v361_v33 = vadd.f32 %v360_v31, %v314_v29  ;;  %v362_v34 = vpop.f32.mrb[1].mxu0 }
  0xfa   : > { %v363_v35 = vadd.f32 %v362_v34, %v314_v29  ;;  %v364_v36 = vpop.f32.mrb[2].mxu0 }
  0xfb   : > { %vm367_vm8 = vcmp.gt.f32.partialorder %v361_v33, 0.0  ;;  %v379_v37 = vmul.f32 %v378_v32, %v361_v33  ;;  %v365_v38 = vpop.f32.mrb[3].mxu0 }
  0xfc   : > { %vm368_vm10 = vcmp.gt.f32.partialorder %v363_v35, 0.0  ;;  %v380_v39 = vmul.f32 %v378_v32, %v363_v35  ;;  %v1146_v38 = vrot.slane %v800_v12, %v521_v8 }
  0xfd   : > { %v381_v40 = vsel %vm367_vm8, %v361_v33, %v379_v37 }
  0xfe   : > { %v388_v41 = vpack.c.bf16 %v381_v40, %v381_v40  ;;  %v382_v42 = vsel %vm368_vm10, %v363_v35, %v380_v39 }
  0xff   : > { %v389_v44 = vpack.c.bf16 %v382_v42, %v382_v42 }
 0x100   : > { %v447_v46 = vand.u32 %v445_v43, %v388_v41 }
 0x101   : > { %v450_v45 = vand.u32 %v445_v43, %v389_v44 }
 0x103   : > { %452 = vmatprep.subr.bf16.mxu0 %v450_v45  ;;  %808 = vmatprep.subr.bf16.mxu1 %v450_v45 }
 0x104   : > { %453 = vmatpush1.bf16.msra.mxu0 %v447_v46  ;;  %809 = vmatpush1.bf16.msra.mxu1 %v447_v46 }
 0x107   : > { %797 = vmatmul.mubr.msk.bf16.vlgmr.msra.gmra.mrb[4].mxu0 %vm433_vm11, %v863_v47  ;;  %798 = vmatmul.mubr.msk.bf16.vlgmr.msra.gmra.mrb[0].mxu1 %vm433_vm11, %v864_v48 }
 0x108   : > { %504 = vmatprep.mubr.bf16.mxu1 %v933_v2 }
 0x10c   : > { %v1111_v55 = vpop.permute.xlu0 %579  ;;  %v618_v56 = vpop.permute.xlu1 %617 }
 0x10f   : > { %799 = vmatmul.mubr.msk.bf16.gmra.mrb[4].mxu1 %vm433_vm11, %v865_v49 }
 0x110   : > { %v576_v57 = vpop.permute.xlu0 %575  ;;  %v1113_v58 = vpop.permute.xlu1 %657 }
 0x114   : > { %v1115_v59 = vpop.permute.xlu0 %594  ;;  %v542_v60 = vpop.permute.xlu1 %541 }
 0x118   : > { %v544_v61 = vpop.permute.xlu0 %543  ;;  %v614_v62 = vpop.permute.xlu1 %613 }
 0x119   : > { %v547_v28 = vsel %vm545_vm12, %v542_v60, %v544_v61 }
 0x11c   : > { %v635_v63 = vpop.permute.xlu0 %634  ;;  %v633_v0 = vpop.permute.xlu1 %632 }
 0x11d   : > { %v638_v33 = vsel %vm636_vm13, %v633_v0, %v635_v63 }
 0x120   : > { %v540_v1 = vpop.permute.xlu0 %539  ;;  %v1117_v2 = vpop.permute.xlu1 %653 }
 0x121   : > { %v546_v19 = vsel %vm545_vm12, %v540_v1, %v542_v60 }
 0x124   : > { %v1119_v3 = vpop.permute.xlu0 %672  ;;  %v597_v4 = vpop.permute.xlu1 %596 }
 0x128   : > { %v616_v5 = vpop.permute.xlu0 %615  ;;  %v1121_v6 = vpop.permute.xlu1 %577 }
 0x129   : > { %v620_v44 = vsel %vm619_vm15, %v614_v62, %v616_v5  ;;  %v582_v48 = vsel %vm581_vm0, %v576_v57, %v1121_v6 }
 0x12c   : > { %v631_v9 = vpop.permute.xlu0 %630  ;;  %v593_v10 = vpop.permute.xlu1 %592 }
 0x12d   : > { %v599_v49 = vsel %vm598_vm14, %v593_v10, %v1115_v59 }
 0x130   : > { %v1143_v36 = vpop.permute.xlu0 %655  ;;  %v671_v60 = vpop.permute.xlu1 %670 }
 0x134   : > { %v669_v10 = vpop.permute.xlu0 %668 }
 0x1da   : > { %v486_v13 = vpop.f32.mrb[4].mxu0  ;;  %v496_v14 = vpop.f32.mrb[0].mxu1 }
 0x1db   : > { %v487_v16 = vadd.f32 %v486_v13, %v398_v50  ;;  %v488_v17 = vpop.f32.mrb[5].mxu0  ;;  %v498_v18 = vpop.f32.mrb[1].mxu1  ;;  %v497_v20 = vadd.f32 %v496_v14, %v408_v51 }
 0x1dc   : > { %v489_v23 = vadd.f32 %v488_v17, %v398_v50  ;;  %v490_v25 = vpop.f32.mrb[6].mxu0  ;;  %v500_v26 = vpop.f32.mrb[2].mxu1  ;;  %v499_v43 = vadd.f32 %v498_v18, %v408_v51  ;;  %v637_v51 = vsel %vm636_vm13, %v631_v9, %v633_v0 }
 0x1dd   : > { %v525_v29 = vmul.f32 %v1128_v11, %v487_v16  ;;  %v550_v30 = vmul.f32 %v546_v19, %v487_v16  ;;  %v492_v31 = vpop.f32.mrb[7].mxu0  ;;  %v502_v32 = vpop.f32.mrb[3].mxu1  ;;  %v491_v39 = vadd.f32 %v490_v25, %v1105_v52  ;;  %v628_v40 = vmul.f32 %v1137_v22, %v497_v20 }
 0x1de   : > { %v526_v34 = vmul.f32 %v1133_v15, %v489_v23  ;;  %v551_v35 = vmul.f32 %v547_v28, %v489_v23  ;;  %v501_v50 = vadd.f32 %v500_v26, %v1107_v53  ;;  %v493_v63 = vadd.f32 %v492_v31, %v1105_v52 }
 0x1df   : > { %v531_v27 = vmul.f32 %v1067_v21, %v525_v29  ;;  %v554_v37 = vrot.slane %v550_v30, 4  ;;  %v573_v46 = vmul.f32 %v1137_v22, %v491_v39  ;;  %v590_v47 = vmul.f32 %v1128_v11, %v491_v39 }
 0x1e0   : > { %v532_v41 = vmul.f32 %v1079_v24, %v526_v34  ;;  %v555_v42 = vrot.slane %v551_v35, 4  ;;  %v621_v21 = vsel %vm619_vm15, %v616_v5, %v618_v56  ;;  %v600_v56 = vsel %vm598_vm14, %v1115_v59, %v597_v4  ;;  %v694_v34 = vpop.permute.xlu0 %693 }
 0x1e1   : > { %v558_v45 = vadd.f32 %v554_v37, %v531_v27  ;;  %v586_v61 = vmul.f32 %v582_v48, %v573_v46  ;;  %v603_v62 = vmul.f32 %v599_v49, %v590_v47  ;;  %v641_v5 = vmul.f32 %v637_v51, %v628_v40 }
 0x1e2   : > { %v506_v24 = vpop.f32.mrb[4].mxu1  ;;  %v559_v7 = vadd.f32 %v555_v42, %v532_v41  ;;  %v629_v57 = vmul.f32 %v1146_v38, %v499_v43  ;;  %v574_v14 = vmul.f32 %v1146_v38, %v493_v63  ;;  %v591_v0 = vmul.f32 %v1133_v15, %v493_v63 }
 0x1e3   : > { %v508_v1 = vpop.f32.mrb[5].mxu1  ;;  %v588_v12 = vadd.f32 %v586_v61, %v558_v45  ;;  %v607_v13 = vrot.slane %v603_v62, 4  ;;  %v583_v52 = vsel %vm581_vm0, %v1121_v6, %v1111_v55  ;;  %v624_v16 = vmul.f32 %v620_v44, %v497_v20  ;;  %v692_v55 = vpop.permute.xlu1 %691 }
 0x1e4   : > { %v510_v8 = vpop.f32.mrb[6].mxu1  ;;  %v651_v59 = vmul.f32 %v1128_v11, %v501_v50  ;;  %v503_v4 = vadd.f32 %v502_v32, %v1107_v53  ;;  %v587_v18 = vmul.f32 %v583_v52, %v574_v14  ;;  %v604_v19 = vmul.f32 %v600_v56, %v591_v0 }
 0x1e5   : > { %v511_v9 = vpop.f32.mrb[7].mxu1  ;;  %v611_v17 = vadd.f32 %v607_v13, %v588_v12  ;;  %v507_v23 = vadd.f32 %v506_v24, %v1109_v54  ;;  %v660_v25 = vsel %vm659_vm1, %v1117_v2, %v1143_v36  ;;  %v675_v26 = vsel %vm674_vm2, %v669_v10, %v671_v60 }
 0x1e6   : > { %v645_v28 = vrot.slane %v641_v5, 4  ;;  %v642_v29 = vmul.f32 %v638_v33, %v629_v57  ;;  %v679_v20 = vmul.f32 %v675_v26, %v501_v50  ;;  %v589_v11 = vadd.f32 %v587_v18, %v559_v7 }
 0x1e7   : > { %v626_v6 = vadd.f32 %v624_v16, %v611_v17  ;;  %v608_v30 = vrot.slane %v604_v19, 4  ;;  %v625_v53 = vmul.f32 %v621_v21, %v499_v43  ;;  %v664_v31 = vmul.f32 %v660_v25, %v651_v59 }
 0x1e8   : > { %v509_v32 = vadd.f32 %v508_v1, %v1109_v54  ;;  %v652_v2 = vmul.f32 %v1133_v15, %v503_v4  ;;  %v689_v37 = vmul.f32 %v1137_v22, %v507_v23  ;;  %v676_v33 = vsel %vm674_vm2, %v671_v60, %v1119_v3  ;;  %v696_v22 = vpop.permute.xlu1 %695 }
 0x1e9   : > { %v649_v35 = vadd.f32 %v645_v28, %v626_v6  ;;  %v612_v27 = vadd.f32 %v608_v30, %v589_v11  ;;  %v646_v39 = vrot.slane %v642_v29, 4  ;;  %v683_v41 = vrot.slane %v679_v20, 4 }
 0x1ea   : > { %v680_v43 = vmul.f32 %v676_v33, %v503_v4  ;;  %v661_v54 = vsel %vm659_vm1, %v1143_v36, %v1113_v58  ;;  %v698_v44 = vsel %vm697_vm3, %v692_v55, %v694_v34  ;;  %v690_v15 = vmul.f32 %v1146_v38, %v509_v32 }
 0x1eb   : > { %v666_v40 = vadd.f32 %v664_v31, %v649_v35  ;;  %v627_v42 = vadd.f32 %v625_v53, %v612_v27  ;;  %v665_v3 = vmul.f32 %v661_v54, %v652_v2  ;;  %v702_v47 = vmul.f32 %v698_v44, %v689_v37 }
 0x1ec   : > { %v684_v48 = vrot.slane %v680_v43, 4  ;;  %v699_v50 = vsel %vm697_vm3, %v694_v34, %v696_v22 }
 0x1ed   : > { %v687_v45 = vadd.f32 %v683_v41, %v666_v40  ;;  %v650_v46 = vadd.f32 %v646_v39, %v627_v42  ;;  %v703_v58 = vmul.f32 %v699_v50, %v690_v15 }
 0x1ef   : > { %v667_v21 = vadd.f32 %v665_v3, %v650_v46  ;;  %v704_v49 = vadd.f32 %v702_v47, %v687_v45 }
 0x1f1   : > { %v688_v24 = vadd.f32 %v684_v48, %v667_v21 }
 0x1f3   : > { %v705_v36 = vadd.f32 %v703_v58, %v688_v24 }
 0x1f5   : > { %v708_v38 = vcombine.low %v704_v49, %v705_v36 }
 0x1f7   : > { %710 = vst [vmem:[%s275_s22] sm:$0xff] %v708_v38 }
 0x1f8   : > { %882 = shalt.err (!%p879_p3)
}
 0x1f9   : > { %s883_s15 = scalar_lea.hbm %s1195_s26, 128  ;;  %s887_s18 = scalar_lea.hbm %s1245_s7, 256 }
 0x1fa   : > { %p884_p4 = scmp.ne.s32.totalorder %s1195_s26, %s883_s15  ;;  %p888_p9 = scmp.lt.u32.totalorder %s1195_s26, %s1245_s7 }
 0x1fb   : > { %p889_p10 = scmp.lt.u32.totalorder %s887_s18, %s883_s15  ;;  %p891_p12 = scmp.lt.u32.totalorder %s883_s15, %s1195_s26 }
 0x1fc   : > { %p885_p7 = pnand %p884_p4, %p1029_p5 }
 0x1fd   : > { %p890_p11 = por %p889_p10, %p888_p9 }
 0x1fe   : > { %p886_p8 = pneg %p885_p7 }
 0x1ff   : > { %p892_p13 = por %p891_p12, %p890_p11 }
 0x201   : > { %p893_p0 = pnand %p892_p13, %p886_p8 }
 0x203   : > { %896 = shalt.err (!%p893_p0)
}
 0x204   : > { %810 = dma.vmem_to_hbm [thread:$0]  (%p1029_p5), %s1197_s23, 128, %s1195_s26, %s712_s27  }
 0x205 PF: > { %p816_p1 = scmp.ge.s32.totalorder %s931_s8, 2  ;;  %s738_s21 = sand.u32 1, %s919_s28  }
 0x206   : > { %s739_s22 = scalar_lea.sflag [#allocation6], %s738_s21 }
 0x207   : > { %p813_p2 = pnand %p816_p1, %p1033_p6 }
 0x209   : > { %914 = dma.done.wait (!%p813_p2), %s739_s22, 128  }
 0x20a   : > { %916 = vsyncadd (!%p813_p2), %s739_s22, 4294967168  ;;  %p21_p3 = scmp.ge.s32.totalorder %s1016_s9, 4   ;;  %s1249_s28 = smov %s923_s29 }
 0x20b   : > { %s1250_s29 = smov %s927_s30  ;;  %s1251_s30 = smov %s1027_s12 }
 0x20c   : > { %s1252_s8 = smov %s1016_s9  ;;  %23 = sbr.rel (!%p21_p3) target bundleno = 6 (0x6), region = 84 }
 0x213   :  { %744 = vsyncpa [#allocation6], 1 }
 0x214   :  { %746 = vsyncpa [#allocation6 + $0x1], 1 }

</bundles_post_ra>
